<compile_context>
chip_gen: v7x
topology: tpu7x:2x2x1
jax: 0.10.0
libtpu: 0.0.40
codegen_flags: <defaults>
</compile_context>

<pallas_src>
import jax
import jax.numpy as jnp
from jax.experimental import pallas as pl
from jax.experimental.pallas import tpu as pltpu


# ----------------------------------------------------------------------------
# Fused whole-network kernel
# ----------------------------------------------------------------------------
def _make_tcn_kernel(kernel_size, num_levels, has_ds, lp, compute_dtype):
    k = kernel_size

    def kernel(*refs):
        x_ref = refs[0]
        o_ref = refs[-1]
        wrefs = refs[1:-1]
        f32 = jnp.float32

        def causal_dilated_conv(h, w_ref, b_ref, dilation):
            # h: (C_in, Lp) f32.  w_ref: (k, C_out, C_in) compute_dtype.
            # out[o, t] = b[o] + sum_j sum_c w[j, o, c] * h[c, t - (k-1-j)*d]
            # with reads before t=0 being zero  == fused causal pad + Chomp1d.
            lane = jax.lax.broadcasted_iota(jnp.int32, h.shape, 1)
            h_lo = h.astype(compute_dtype)
            acc = None
            for j in range(k):                      # static unroll over taps
                s = (k - 1 - j) * dilation          # right-shift of this tap
                if s == 0:
                    v = h_lo                        # last tap: no roll/mask
                elif s >= lp:
                    continue                        # tap entirely in the pad
                else:
                    v = pltpu.roll(h, shift=s, axis=1)            # XLU
                    v = jnp.where(lane >= s, v, 0.0).astype(compute_dtype)
                part = jnp.dot(w_ref[j], v, preferred_element_type=f32)  # MXU
                acc = part if acc is None else acc + part
            if acc is None:
                acc = jnp.zeros((w_ref.shape[1], lp), f32)
            return acc + b_ref[...]                 # (C_out, 1) broadcasts

        h = x_ref[0].astype(f32)                    # (C0, Lp), resident block
        wi = 0
        for lvl in range(num_levels):               # static unroll over levels
            d = 2 ** lvl
            w1, b1, w2, b2 = wrefs[wi], wrefs[wi + 1], wrefs[wi + 2], wrefs[wi + 3]
            wi += 4

            h1 = jnp.maximum(causal_dilated_conv(h, w1, b1, d), 0.0)
            # TODO(synk): Dropout(0.2) omitted — identity in eval-mode forward.
            h2 = jnp.maximum(causal_dilated_conv(h1, w2, b2, d), 0.0)

            if has_ds[lvl]:
                wd, bd = wrefs[wi], wrefs[wi + 1]
                wi += 2
                res = jnp.dot(wd[...], h.astype(compute_dtype),
                              preferred_element_type=f32) + bd[...]
            else:
                res = h                             # identity residual (f32)
            h = jnp.maximum(h2 + res, 0.0)

        o_ref[0] = h.astype(o_ref.dtype)            # lane-dense, unmasked store

    return kernel


# ----------------------------------------------------------------------------
# weight_norm (dim=0) -> effective conv weight
# ----------------------------------------------------------------------------
def _weight_norm(v, g):
    # v: (C_out, C_in, k), g: (C_out, 1, 1)
    norm = jnp.sqrt(jnp.sum(v * v, axis=(1, 2), keepdims=True))
    return v * (g / norm)


def _round_up(x, m):
    return ((x + m - 1) // m) * m


# ----------------------------------------------------------------------------
# TemporalConvNet forward = one fused pallas_call over all levels
# ----------------------------------------------------------------------------
def temporal_conv_net(x, layer_params, kernel_size=2, compute_dtype=jnp.bfloat16):
    """Eval-mode forward of TemporalConvNet as a single fused Pallas kernel."""
    N, c0, L = x.shape
    k = kernel_size
    lp = max(128, _round_up(L, 128))        # lane-dense, 128-aligned time axis
    xp = jnp.pad(x.astype(jnp.float32), ((0, 0), (0, 0), (0, lp - L)))

    inputs = [xp]
    in_specs = [pl.BlockSpec((1, c0, lp), lambda n: (n, 0, 0))]
    has_ds = []
    c_prev = c0
    for params in layer_params:
        w1 = _weight_norm(params["w1_v"], params["w1_g"])        # (C_out, C_in, k)
        w2 = _weight_norm(params["w2_v"], params["w2_g"])        # (C_out, C_out, k)
        c_out = w1.shape[0]
        w1t = jnp.transpose(w1, (2, 0, 1)).astype(compute_dtype)  # (k, C_out, C_in)
        w2t = jnp.transpose(w2, (2, 0, 1)).astype(compute_dtype)
        b1 = params["b1"].reshape(c_out, 1).astype(jnp.float32)
        b2 = params["b2"].reshape(c_out, 1).astype(jnp.float32)

        inputs += [w1t, b1, w2t, b2]
        in_specs += [
            pl.BlockSpec(w1t.shape, lambda n: (0, 0, 0)),
            pl.BlockSpec(b1.shape, lambda n: (0, 0)),
            pl.BlockSpec(w2t.shape, lambda n: (0, 0, 0)),
            pl.BlockSpec(b2.shape, lambda n: (0, 0)),
        ]
        ds = "wd" in params
        has_ds.append(ds)
        if ds:
            wd = params["wd"][:, :, 0].astype(compute_dtype)      # (C_out, C_in)
            bd = params["bd"].reshape(c_out, 1).astype(jnp.float32)
            inputs += [wd, bd]
            in_specs += [
                pl.BlockSpec(wd.shape, lambda n: (0, 0)),
                pl.BlockSpec(bd.shape, lambda n: (0, 0)),
            ]
        c_prev = c_out

    kernel = _make_tcn_kernel(k, len(layer_params), tuple(has_ds), lp, compute_dtype)

    out = pl.pallas_call(
        kernel,
        out_shape=jax.ShapeDtypeStruct((N, c_prev, lp), x.dtype),
        grid_spec=pltpu.PrefetchScalarGridSpec(
            num_scalar_prefetch=0,
            grid=(N,),
            in_specs=in_specs,
            out_specs=pl.BlockSpec((1, c_prev, lp), lambda n: (n, 0, 0)),
        ),
        compiler_params=pltpu.CompilerParams(
            dimension_semantics=("parallel",),
            # Default scoped VMEM (16/32 MiB) is far below physical; give the
            # fused stack explicit headroom (still within v7x's 64 MiB).
            vmem_limit_bytes=64 * 1024 * 1024,
        ),
    )(*inputs)
    return out[:, :, :L]


# ----------------------------------------------------------------------------
# Pure-JAX reference (for correctness checking only)
# ----------------------------------------------------------------------------
def _ref_causal_conv(x, w, b, d):
    # x: (N, C_in, L), w: (C_out, C_in, k), b: (C_out,)
    N, C_in, L = x.shape
    C_out, _, k = w.shape
    p = (k - 1) * d
    xp = jnp.pad(x, ((0, 0), (0, 0), (p, 0)))
    out = jnp.zeros((N, C_out, L), jnp.float32)
    for j in range(k):
        out = out + jnp.einsum("oc,ncl->nol", w[:, :, j], xp[:, :, j * d: j * d + L])
    return out + b.reshape(1, -1, 1)


def _ref_block(x, params, k, d):
    w1 = _weight_norm(params["w1_v"], params["w1_g"])
    h = jnp.maximum(_ref_causal_conv(x, w1, params["b1"], d), 0.0)
    w2 = _weight_norm(params["w2_v"], params["w2_g"])
    h = jnp.maximum(_ref_causal_conv(h, w2, params["b2"], d), 0.0)
    if "wd" in params:
        res = (jnp.einsum("oc,ncl->nol", params["wd"][:, :, 0], x)
               + params["bd"].reshape(1, -1, 1))
    else:
        res = x
    return jnp.maximum(h + res, 0.0)


def _ref_tcn(x, layer_params, kernel_size=2):
    out = x
    for i, params in enumerate(layer_params):
        out = _ref_block(out, params, kernel_size, 2 ** i)
    return out


# ----------------------------------------------------------------------------
# Deterministic parameter construction (g != ||v|| so weight_norm is exercised)
# ----------------------------------------------------------------------------
def init_tcn_params(key, num_inputs, num_channels, kernel_size):
    params = []
    for i, c_out in enumerate(num_channels):
        c_in = num_inputs if i == 0 else num_channels[i - 1]
        key, *sub = jax.random.split(key, 8)
        w1_v = 0.01 * jax.random.normal(sub[0], (c_out, c_in, kernel_size), jnp.float32)
        w2_v = 0.01 * jax.random.normal(sub[1], (c_out, c_out, kernel_size), jnp.float32)
        g1 = (jnp.sqrt(jnp.sum(w1_v ** 2, axis=(1, 2), keepdims=True))
              * (0.5 + jax.random.uniform(sub[2], (c_out, 1, 1), jnp.float32)))
        g2 = (jnp.sqrt(jnp.sum(w2_v ** 2, axis=(1, 2), keepdims=True))
              * (0.5 + jax.random.uniform(sub[3], (c_out, 1, 1), jnp.float32)))
        layer = {
            "w1_v": w1_v, "w1_g": g1,
            "b1": 0.1 * jax.random.normal(sub[4], (c_out,), jnp.float32),
            "w2_v": w2_v, "w2_g": g2,
            "b2": 0.1 * jax.random.normal(sub[5], (c_out,), jnp.float32),
        }
        if c_in != c_out:  # downsample 1x1 conv, same as the PyTorch module
            kd, kb = jax.random.split(sub[6])
            layer["wd"] = 0.01 * jax.random.normal(kd, (c_out, c_in, 1), jnp.float32)
            layer["bd"] = 0.1 * jax.random.normal(kb, (c_out,), jnp.float32)
        params.append(layer)
    return params


if __name__ == "__main__":
    key = jax.random.PRNGKey(0)
    N, C_in, L = 2, 4, 16
    num_channels = (8, 8)   # level 0: 4->8 (downsample path), level 1: 8->8 (identity)
    kernel_size = 2

    key, xkey = jax.random.split(key)
    x = jax.random.normal(xkey, (N, C_in, L), dtype=jnp.float32)
    params = init_tcn_params(key, C_in, num_channels, kernel_size)

    out = temporal_conv_net(x, params, kernel_size)
    out = jax.block_until_ready(out)

    ref = _ref_tcn(x, params, kernel_size)
    assert out.shape == (N, num_channels[-1], L), out.shape
    assert out.dtype == x.dtype
    max_err = float(jnp.max(jnp.abs(out.astype(jnp.float32) - ref)))
    # MXU operands are bf16 (accumulation stays f32); reference is pure f32,
    # hence the relaxed tolerance.
    assert max_err < 1e-2, f"max abs err {max_err}"

    print("KERNEL_OK")
</pallas_src>

<mosaic_0001>
module attributes {stable_mosaic.version = 11 : i64} {
  func.func @kernel(%arg0: i32, %arg1: memref<1x4x128xf32, #tpu.memory_space<vmem>>, %arg2: memref<2x8x4xbf16, #tpu.memory_space<vmem>>, %arg3: memref<8x1xf32, #tpu.memory_space<vmem>>, %arg4: memref<2x8x8xbf16, #tpu.memory_space<vmem>>, %arg5: memref<8x1xf32, #tpu.memory_space<vmem>>, %arg6: memref<8x4xbf16, #tpu.memory_space<vmem>>, %arg7: memref<8x1xf32, #tpu.memory_space<vmem>>, %arg8: memref<2x8x8xbf16, #tpu.memory_space<vmem>>, %arg9: memref<8x1xf32, #tpu.memory_space<vmem>>, %arg10: memref<2x8x8xbf16, #tpu.memory_space<vmem>>, %arg11: memref<8x1xf32, #tpu.memory_space<vmem>>, %arg12: memref<1x8x128xf32, #tpu.memory_space<vmem>>) attributes {dimension_semantics = [#tpu.dimension_semantics<parallel>], iteration_bounds = array<i64: 2>, scalar_prefetch = 0 : i64, scratch_operands = 0 : i64, tpu.core_type = #tpu.core_type<tc>, window_params = [{transform_indices = @transform_0, window_bounds = array<i64: 1, 4, 128>}, {pipeline_mode = #tpu.pipeline_mode<synchronous>, transform_indices = @transform_1, window_bounds = array<i64: 2, 8, 4>}, {pipeline_mode = #tpu.pipeline_mode<synchronous>, transform_indices = @transform_2, window_bounds = array<i64: 8, 1>}, {pipeline_mode = #tpu.pipeline_mode<synchronous>, transform_indices = @transform_3, window_bounds = array<i64: 2, 8, 8>}, {pipeline_mode = #tpu.pipeline_mode<synchronous>, transform_indices = @transform_4, window_bounds = array<i64: 8, 1>}, {pipeline_mode = #tpu.pipeline_mode<synchronous>, transform_indices = @transform_5, window_bounds = array<i64: 8, 4>}, {pipeline_mode = #tpu.pipeline_mode<synchronous>, transform_indices = @transform_6, window_bounds = array<i64: 8, 1>}, {pipeline_mode = #tpu.pipeline_mode<synchronous>, transform_indices = @transform_7, window_bounds = array<i64: 2, 8, 8>}, {pipeline_mode = #tpu.pipeline_mode<synchronous>, transform_indices = @transform_8, window_bounds = array<i64: 8, 1>}, {pipeline_mode = #tpu.pipeline_mode<synchronous>, transform_indices = @transform_9, window_bounds = array<i64: 2, 8, 8>}, {pipeline_mode = #tpu.pipeline_mode<synchronous>, transform_indices = @transform_10, window_bounds = array<i64: 8, 1>}, {transform_indices = @transform_11, window_bounds = array<i64: 1, 8, 128>}]} {
    %c0 = arith.constant 0 : index
    %c0_0 = arith.constant 0 : index
    %c0_1 = arith.constant 0 : index
    %0 = vector.load %arg1[%c0, %c0_0, %c0_1] : memref<1x4x128xf32, #tpu.memory_space<vmem>>, vector<1x4x128xf32>
    %1 = vector.shape_cast %0 : vector<1x4x128xf32> to vector<4x128xf32>
    %2 = tpu.iota {dimensions = array<i32: 1>} : vector<4x128xi32>
    %3 = arith.truncf %1 : vector<4x128xf32> to vector<4x128xbf16>
    %c1_i32 = arith.constant 1 : i32
    %4 = tpu.dynamic_rotate %1 by %c1_i32 dim 1 : vector<4x128xf32>, i32 -> vector<4x128xf32>
    %c1_i32_2 = arith.constant 1 : i32
    %5 = vector.broadcast %c1_i32_2 : i32 to vector<4x128xi32>
    %6 = arith.cmpi sge, %2, %5 : vector<4x128xi32>
    %cst = arith.constant 0.000000e+00 : f32
    %7 = vector.broadcast %cst : f32 to vector<4x128xf32>
    %8 = arith.select %6, %4, %7 : vector<4x128xi1>, vector<4x128xf32>
    %9 = arith.truncf %8 : vector<4x128xf32> to vector<4x128xbf16>
    %c0_3 = arith.constant 0 : index
    %c0_4 = arith.constant 0 : index
    %c0_5 = arith.constant 0 : index
    %10 = vector.load %arg2[%c0_3, %c0_4, %c0_5] : memref<2x8x4xbf16, #tpu.memory_space<vmem>>, vector<1x8x4xbf16>
    %11 = vector.shape_cast %10 : vector<1x8x4xbf16> to vector<8x4xbf16>
    %cst_6 = arith.constant dense<0.000000e+00> : vector<8x128xf32>
    %12 = tpu.matmul %11, %9, %cst_6 {dimension_numbers = #tpu.dot_dimension_numbers<[1], [0], [0], [1], [0, 0, 1, 1], [], []>} : vector<8x4xbf16>, vector<4x128xbf16>, vector<8x128xf32> -> vector<8x128xf32>
    %c1 = arith.constant 1 : index
    %c0_7 = arith.constant 0 : index
    %c0_8 = arith.constant 0 : index
    %13 = vector.load %arg2[%c1, %c0_7, %c0_8] : memref<2x8x4xbf16, #tpu.memory_space<vmem>>, vector<1x8x4xbf16>
    %14 = vector.shape_cast %13 : vector<1x8x4xbf16> to vector<8x4xbf16>
    %cst_9 = arith.constant dense<0.000000e+00> : vector<8x128xf32>
    %15 = tpu.matmul %14, %3, %cst_9 {dimension_numbers = #tpu.dot_dimension_numbers<[1], [0], [0], [1], [0, 0, 1, 1], [], []>} : vector<8x4xbf16>, vector<4x128xbf16>, vector<8x128xf32> -> vector<8x128xf32>
    %16 = arith.addf %12, %15 : vector<8x128xf32>
    %c0_10 = arith.constant 0 : index
    %c0_11 = arith.constant 0 : index
    %17 = vector.load %arg3[%c0_10, %c0_11] : memref<8x1xf32, #tpu.memory_space<vmem>>, vector<8x1xf32>
    %18 = vector.broadcast %17 : vector<8x1xf32> to vector<8x128xf32>
    %19 = arith.addf %16, %18 : vector<8x128xf32>
    %cst_12 = arith.constant 0.000000e+00 : f32
    %20 = vector.broadcast %cst_12 : f32 to vector<8x128xf32>
    %21 = arith.maximumf %19, %20 : vector<8x128xf32>
    %22 = tpu.iota {dimensions = array<i32: 1>} : vector<8x128xi32>
    %23 = arith.truncf %21 : vector<8x128xf32> to vector<8x128xbf16>
    %c1_i32_13 = arith.constant 1 : i32
    %24 = tpu.dynamic_rotate %21 by %c1_i32_13 dim 1 : vector<8x128xf32>, i32 -> vector<8x128xf32>
    %c1_i32_14 = arith.constant 1 : i32
    %25 = vector.broadcast %c1_i32_14 : i32 to vector<8x128xi32>
    %26 = arith.cmpi sge, %22, %25 : vector<8x128xi32>
    %cst_15 = arith.constant 0.000000e+00 : f32
    %27 = vector.broadcast %cst_15 : f32 to vector<8x128xf32>
    %28 = arith.select %26, %24, %27 : vector<8x128xi1>, vector<8x128xf32>
    %29 = arith.truncf %28 : vector<8x128xf32> to vector<8x128xbf16>
    %c0_16 = arith.constant 0 : index
    %c0_17 = arith.constant 0 : index
    %c0_18 = arith.constant 0 : index
    %30 = vector.load %arg4[%c0_16, %c0_17, %c0_18] : memref<2x8x8xbf16, #tpu.memory_space<vmem>>, vector<1x8x8xbf16>
    %31 = vector.shape_cast %30 : vector<1x8x8xbf16> to vector<8x8xbf16>
    %cst_19 = arith.constant dense<0.000000e+00> : vector<8x128xf32>
    %32 = tpu.matmul %31, %29, %cst_19 {dimension_numbers = #tpu.dot_dimension_numbers<[1], [0], [0], [1], [0, 0, 1, 1], [], []>} : vector<8x8xbf16>, vector<8x128xbf16>, vector<8x128xf32> -> vector<8x128xf32>
    %c1_20 = arith.constant 1 : index
    %c0_21 = arith.constant 0 : index
    %c0_22 = arith.constant 0 : index
    %33 = vector.load %arg4[%c1_20, %c0_21, %c0_22] : memref<2x8x8xbf16, #tpu.memory_space<vmem>>, vector<1x8x8xbf16>
    %34 = vector.shape_cast %33 : vector<1x8x8xbf16> to vector<8x8xbf16>
    %cst_23 = arith.constant dense<0.000000e+00> : vector<8x128xf32>
    %35 = tpu.matmul %34, %23, %cst_23 {dimension_numbers = #tpu.dot_dimension_numbers<[1], [0], [0], [1], [0, 0, 1, 1], [], []>} : vector<8x8xbf16>, vector<8x128xbf16>, vector<8x128xf32> -> vector<8x128xf32>
    %36 = arith.addf %32, %35 : vector<8x128xf32>
    %c0_24 = arith.constant 0 : index
    %c0_25 = arith.constant 0 : index
    %37 = vector.load %arg5[%c0_24, %c0_25] : memref<8x1xf32, #tpu.memory_space<vmem>>, vector<8x1xf32>
    %38 = vector.broadcast %37 : vector<8x1xf32> to vector<8x128xf32>
    %39 = arith.addf %36, %38 : vector<8x128xf32>
    %cst_26 = arith.constant 0.000000e+00 : f32
    %40 = vector.broadcast %cst_26 : f32 to vector<8x128xf32>
    %41 = arith.maximumf %39, %40 : vector<8x128xf32>
    %c0_27 = arith.constant 0 : index
    %c0_28 = arith.constant 0 : index
    %42 = vector.load %arg6[%c0_27, %c0_28] : memref<8x4xbf16, #tpu.memory_space<vmem>>, vector<8x4xbf16>
    %43 = arith.truncf %1 : vector<4x128xf32> to vector<4x128xbf16>
    %cst_29 = arith.constant dense<0.000000e+00> : vector<8x128xf32>
    %44 = tpu.matmul %42, %43, %cst_29 {dimension_numbers = #tpu.dot_dimension_numbers<[1], [0], [0], [1], [0, 0, 1, 1], [], []>} : vector<8x4xbf16>, vector<4x128xbf16>, vector<8x128xf32> -> vector<8x128xf32>
    %c0_30 = arith.constant 0 : index
    %c0_31 = arith.constant 0 : index
    %45 = vector.load %arg7[%c0_30, %c0_31] : memref<8x1xf32, #tpu.memory_space<vmem>>, vector<8x1xf32>
    %46 = vector.broadcast %45 : vector<8x1xf32> to vector<8x128xf32>
    %47 = arith.addf %44, %46 : vector<8x128xf32>
    %48 = arith.addf %41, %47 : vector<8x128xf32>
    %cst_32 = arith.constant 0.000000e+00 : f32
    %49 = vector.broadcast %cst_32 : f32 to vector<8x128xf32>
    %50 = arith.maximumf %48, %49 : vector<8x128xf32>
    %51 = tpu.iota {dimensions = array<i32: 1>} : vector<8x128xi32>
    %52 = arith.truncf %50 : vector<8x128xf32> to vector<8x128xbf16>
    %c2_i32 = arith.constant 2 : i32
    %53 = tpu.dynamic_rotate %50 by %c2_i32 dim 1 : vector<8x128xf32>, i32 -> vector<8x128xf32>
    %c2_i32_33 = arith.constant 2 : i32
    %54 = vector.broadcast %c2_i32_33 : i32 to vector<8x128xi32>
    %55 = arith.cmpi sge, %51, %54 : vector<8x128xi32>
    %cst_34 = arith.constant 0.000000e+00 : f32
    %56 = vector.broadcast %cst_34 : f32 to vector<8x128xf32>
    %57 = arith.select %55, %53, %56 : vector<8x128xi1>, vector<8x128xf32>
    %58 = arith.truncf %57 : vector<8x128xf32> to vector<8x128xbf16>
    %c0_35 = arith.constant 0 : index
    %c0_36 = arith.constant 0 : index
    %c0_37 = arith.constant 0 : index
    %59 = vector.load %arg8[%c0_35, %c0_36, %c0_37] : memref<2x8x8xbf16, #tpu.memory_space<vmem>>, vector<1x8x8xbf16>
    %60 = vector.shape_cast %59 : vector<1x8x8xbf16> to vector<8x8xbf16>
    %cst_38 = arith.constant dense<0.000000e+00> : vector<8x128xf32>
    %61 = tpu.matmul %60, %58, %cst_38 {dimension_numbers = #tpu.dot_dimension_numbers<[1], [0], [0], [1], [0, 0, 1, 1], [], []>} : vector<8x8xbf16>, vector<8x128xbf16>, vector<8x128xf32> -> vector<8x128xf32>
    %c1_39 = arith.constant 1 : index
    %c0_40 = arith.constant 0 : index
    %c0_41 = arith.constant 0 : index
    %62 = vector.load %arg8[%c1_39, %c0_40, %c0_41] : memref<2x8x8xbf16, #tpu.memory_space<vmem>>, vector<1x8x8xbf16>
    %63 = vector.shape_cast %62 : vector<1x8x8xbf16> to vector<8x8xbf16>
    %cst_42 = arith.constant dense<0.000000e+00> : vector<8x128xf32>
    %64 = tpu.matmul %63, %52, %cst_42 {dimension_numbers = #tpu.dot_dimension_numbers<[1], [0], [0], [1], [0, 0, 1, 1], [], []>} : vector<8x8xbf16>, vector<8x128xbf16>, vector<8x128xf32> -> vector<8x128xf32>
    %65 = arith.addf %61, %64 : vector<8x128xf32>
    %c0_43 = arith.constant 0 : index
    %c0_44 = arith.constant 0 : index
    %66 = vector.load %arg9[%c0_43, %c0_44] : memref<8x1xf32, #tpu.memory_space<vmem>>, vector<8x1xf32>
    %67 = vector.broadcast %66 : vector<8x1xf32> to vector<8x128xf32>
    %68 = arith.addf %65, %67 : vector<8x128xf32>
    %cst_45 = arith.constant 0.000000e+00 : f32
    %69 = vector.broadcast %cst_45 : f32 to vector<8x128xf32>
    %70 = arith.maximumf %68, %69 : vector<8x128xf32>
    %71 = tpu.iota {dimensions = array<i32: 1>} : vector<8x128xi32>
    %72 = arith.truncf %70 : vector<8x128xf32> to vector<8x128xbf16>
    %c2_i32_46 = arith.constant 2 : i32
    %73 = tpu.dynamic_rotate %70 by %c2_i32_46 dim 1 : vector<8x128xf32>, i32 -> vector<8x128xf32>
    %c2_i32_47 = arith.constant 2 : i32
    %74 = vector.broadcast %c2_i32_47 : i32 to vector<8x128xi32>
    %75 = arith.cmpi sge, %71, %74 : vector<8x128xi32>
    %cst_48 = arith.constant 0.000000e+00 : f32
    %76 = vector.broadcast %cst_48 : f32 to vector<8x128xf32>
    %77 = arith.select %75, %73, %76 : vector<8x128xi1>, vector<8x128xf32>
    %78 = arith.truncf %77 : vector<8x128xf32> to vector<8x128xbf16>
    %c0_49 = arith.constant 0 : index
    %c0_50 = arith.constant 0 : index
    %c0_51 = arith.constant 0 : index
    %79 = vector.load %arg10[%c0_49, %c0_50, %c0_51] : memref<2x8x8xbf16, #tpu.memory_space<vmem>>, vector<1x8x8xbf16>
    %80 = vector.shape_cast %79 : vector<1x8x8xbf16> to vector<8x8xbf16>
    %cst_52 = arith.constant dense<0.000000e+00> : vector<8x128xf32>
    %81 = tpu.matmul %80, %78, %cst_52 {dimension_numbers = #tpu.dot_dimension_numbers<[1], [0], [0], [1], [0, 0, 1, 1], [], []>} : vector<8x8xbf16>, vector<8x128xbf16>, vector<8x128xf32> -> vector<8x128xf32>
    %c1_53 = arith.constant 1 : index
    %c0_54 = arith.constant 0 : index
    %c0_55 = arith.constant 0 : index
    %82 = vector.load %arg10[%c1_53, %c0_54, %c0_55] : memref<2x8x8xbf16, #tpu.memory_space<vmem>>, vector<1x8x8xbf16>
    %83 = vector.shape_cast %82 : vector<1x8x8xbf16> to vector<8x8xbf16>
    %cst_56 = arith.constant dense<0.000000e+00> : vector<8x128xf32>
    %84 = tpu.matmul %83, %72, %cst_56 {dimension_numbers = #tpu.dot_dimension_numbers<[1], [0], [0], [1], [0, 0, 1, 1], [], []>} : vector<8x8xbf16>, vector<8x128xbf16>, vector<8x128xf32> -> vector<8x128xf32>
    %85 = arith.addf %81, %84 : vector<8x128xf32>
    %c0_57 = arith.constant 0 : index
    %c0_58 = arith.constant 0 : index
    %86 = vector.load %arg11[%c0_57, %c0_58] : memref<8x1xf32, #tpu.memory_space<vmem>>, vector<8x1xf32>
    %87 = vector.broadcast %86 : vector<8x1xf32> to vector<8x128xf32>
    %88 = arith.addf %85, %87 : vector<8x128xf32>
    %cst_59 = arith.constant 0.000000e+00 : f32
    %89 = vector.broadcast %cst_59 : f32 to vector<8x128xf32>
    %90 = arith.maximumf %88, %89 : vector<8x128xf32>
    %91 = arith.addf %90, %50 : vector<8x128xf32>
    %cst_60 = arith.constant 0.000000e+00 : f32
    %92 = vector.broadcast %cst_60 : f32 to vector<8x128xf32>
    %93 = arith.maximumf %91, %92 : vector<8x128xf32>
    %c0_61 = arith.constant 0 : index
    %c0_62 = arith.constant 0 : index
    %c0_63 = arith.constant 0 : index
    %94 = vector.load %arg12[%c0_61, %c0_62, %c0_63] : memref<1x8x128xf32, #tpu.memory_space<vmem>>, vector<1x8x128xf32>
    %95 = vector.shape_cast %94 : vector<1x8x128xf32> to vector<8x128xf32>
    %96 = vector.shape_cast %93 : vector<8x128xf32> to vector<1x8x128xf32>
    tpu.vector_store %arg12[%c0_61, %c0_62, %c0_63], %96 {strides = array<i32>} : memref<1x8x128xf32, #tpu.memory_space<vmem>>, vector<1x8x128xf32>,
    return
  }
  func.func @transform_0(%arg0: i32) -> (i32, i32, i32) {
    %c0_i32 = arith.constant 0 : i32
    %c0_i32_0 = arith.constant 0 : i32
    %c0_i32_1 = arith.constant 0 : i32
    return %arg0, %c0_i32, %c0_i32_0 : i32, i32, i32
  }
  func.func @transform_1(%arg0: i32) -> (i32, i32, i32) {
    %c0_i32 = arith.constant 0 : i32
    %c0_i32_0 = arith.constant 0 : i32
    %c0_i32_1 = arith.constant 0 : i32
    %c0_i32_2 = arith.constant 0 : i32
    return %c0_i32, %c0_i32_0, %c0_i32_1 : i32, i32, i32
  }
  func.func @transform_2(%arg0: i32) -> (i32, i32) {
    %c0_i32 = arith.constant 0 : i32
    %c0_i32_0 = arith.constant 0 : i32
    %c0_i32_1 = arith.constant 0 : i32
    return %c0_i32, %c0_i32_0 : i32, i32
  }
  func.func @transform_3(%arg0: i32) -> (i32, i32, i32) {
    %c0_i32 = arith.constant 0 : i32
    %c0_i32_0 = arith.constant 0 : i32
    %c0_i32_1 = arith.constant 0 : i32
    %c0_i32_2 = arith.constant 0 : i32
    return %c0_i32, %c0_i32_0, %c0_i32_1 : i32, i32, i32
  }
  func.func @transform_4(%arg0: i32) -> (i32, i32) {
    %c0_i32 = arith.constant 0 : i32
    %c0_i32_0 = arith.constant 0 : i32
    %c0_i32_1 = arith.constant 0 : i32
    return %c0_i32, %c0_i32_0 : i32, i32
  }
  func.func @transform_5(%arg0: i32) -> (i32, i32) {
    %c0_i32 = arith.constant 0 : i32
    %c0_i32_0 = arith.constant 0 : i32
    %c0_i32_1 = arith.constant 0 : i32
    return %c0_i32, %c0_i32_0 : i32, i32
  }
  func.func @transform_6(%arg0: i32) -> (i32, i32) {
    %c0_i32 = arith.constant 0 : i32
    %c0_i32_0 = arith.constant 0 : i32
    %c0_i32_1 = arith.constant 0 : i32
    return %c0_i32, %c0_i32_0 : i32, i32
  }
  func.func @transform_7(%arg0: i32) -> (i32, i32, i32) {
    %c0_i32 = arith.constant 0 : i32
    %c0_i32_0 = arith.constant 0 : i32
    %c0_i32_1 = arith.constant 0 : i32
    %c0_i32_2 = arith.constant 0 : i32
    return %c0_i32, %c0_i32_0, %c0_i32_1 : i32, i32, i32
  }
  func.func @transform_8(%arg0: i32) -> (i32, i32) {
    %c0_i32 = arith.constant 0 : i32
    %c0_i32_0 = arith.constant 0 : i32
    %c0_i32_1 = arith.constant 0 : i32
    return %c0_i32, %c0_i32_0 : i32, i32
  }
  func.func @transform_9(%arg0: i32) -> (i32, i32, i32) {
    %c0_i32 = arith.constant 0 : i32
    %c0_i32_0 = arith.constant 0 : i32
    %c0_i32_1 = arith.constant 0 : i32
    %c0_i32_2 = arith.constant 0 : i32
    return %c0_i32, %c0_i32_0, %c0_i32_1 : i32, i32, i32
  }
  func.func @transform_10(%arg0: i32) -> (i32, i32) {
    %c0_i32 = arith.constant 0 : i32
    %c0_i32_0 = arith.constant 0 : i32
    %c0_i32_1 = arith.constant 0 : i32
    return %c0_i32, %c0_i32_0 : i32, i32
  }
  func.func @transform_11(%arg0: i32) -> (i32, i32, i32) {
    %c0_i32 = arith.constant 0 : i32
    %c0_i32_0 = arith.constant 0 : i32
    %c0_i32_1 = arith.constant 0 : i32
    return %arg0, %c0_i32, %c0_i32_0 : i32, i32, i32
  }
}

</mosaic_0001>

<bundles_post_ra>
// kernel: tpu_custom_call.1
= control target key start
LH: loop header
LB: loop body
LE: loop exit
PB: predicated region body
PF: predicated region fallthrough
CT: control target
= control target key end

     0   :  { %s2430_s0 = inlined_call_operand.hbm [shape: f32[2,4,128], index: 0, kind: input, shape index: {}]   ;;  %s2431_s1 = inlined_call_operand.hbm [shape: bf16[2,8,4], index: 1, kind: input, shape index: {}]   ;;  %s2432_s2 = inlined_call_operand.hbm [shape: f32[8,1], index: 2, kind: input, shape index: {}]   ;;  %s2433_s3 = inlined_call_operand.hbm [shape: bf16[2,8,8], index: 3, kind: input, shape index: {}]   ;;  %s2434_s4 = inlined_call_operand.hbm [shape: f32[8,1], index: 4, kind: input, shape index: {}]   ;;  %s2435_s5 = inlined_call_operand.hbm [shape: bf16[8,4], index: 5, kind: input, shape index: {}]   ;;  %s2436_s6 = inlined_call_operand.hbm [shape: f32[8,1], index: 6, kind: input, shape index: {}]   ;;  %s2437_s7 = inlined_call_operand.hbm [shape: bf16[2,8,8], index: 7, kind: input, shape index: {}]   ;;  %s2438_s8 = inlined_call_operand.hbm [shape: f32[8,1], index: 8, kind: input, shape index: {}]   ;;  %s2439_s9 = inlined_call_operand.hbm [shape: bf16[2,8,8], index: 9, kind: input, shape index: {}]   ;;  %s2440_s10 = inlined_call_operand.hbm [shape: f32[8,1], index: 10, kind: input, shape index: {}]   ;;  %s2441_s11 = inlined_call_operand.hbm [shape: f32[2,8,128], index: 11, kind: output, shape index: {}]  }
   0x1   :  { %2450 = sst [smem:[#allocation29_spill]] %s2430_s0 }
   0x2   :  { %2451 = sst [smem:[#allocation30_spill]] %s2431_s1 }
   0x3   :  { %2452 = sst [smem:[#allocation31_spill]] %s2432_s2 }
   0x4   :  { %2453 = sst [smem:[#allocation32_spill]] %s2441_s11 }
   0x5   :  { %16 = vsyncpa [#allocation3], 0 }
   0x6   :  { %18 = vsyncpa [#allocation3 + $0x1], 0 }
   0x7   :  { %19 = vsyncpa [#allocation6], 0 }
   0x8   :  { %20 = vsyncpa [#allocation9], 0 }
   0x9   :  { %21 = vsyncpa [#allocation12], 0 }
   0xa   :  { %22 = vsyncpa [#allocation15], 0 }
   0xb   :  { %23 = vsyncpa [#allocation18], 0 }
   0xc   :  { %24 = vsyncpa [#allocation4], 0 }
   0xd   :  { %26 = vsyncpa [#allocation4 + $0x1], 0  ;;  %s1957_s17 = smov 0   ;;  %s1959_s18 = smov 0  }
   0xe   :  { %s1961_s19 = smov 0   ;;  %s1963_s20 = smov 0  }
   0xf LB: > { %s1878_s21 = smov [#allocation5]   ;;  %s1978_s23 = sadd.s32 4294967295, %s1876_s20   ;;  %s1876_s20 = sphi %s1963_s20, %s2487_s20   ;;  %s1872_s19 = sphi %s1961_s19, %s2486_s19   ;;  %s1868_s18 = sphi %s1959_s18, %s2485_s18   ;;  %s1864_s17 = sphi %s1957_s17, %s2484_s17  }
  0x10   : > { %s311_s22 = sshll.u32 %s1878_s21, 4  ;;  %p1212_p0 = scmp.ge.s32.totalorder %s1876_s20, 1  ;;  %s1983_s22 = int_to_ptr.vmem [resolvable:$true] %s311_s22 }
  0x11   : > { %p2447_p1 = scmp.eq.s32.totalorder %s1978_s23, 0  ;;  %p299_p2 = scmp.lt.s32.totalorder %s1876_s20, 3 }
  0x12   : > { %s1879_s25 = smov [#allocation8]   ;;  %s1880_s28 = smov [#allocation11]  }
  0x13   : > { %p1985_p3 = pnand %p1212_p0, %p299_p2  ;;  %s335_s26 = sshll.u32 %s1879_s25, 4  ;;  %s1998_s26 = int_to_ptr.vmem [resolvable:$true] %s335_s26 }
  0x14   : > { %s360_s29 = sshll.u32 %s1880_s28, 4  ;;  %s2457_s1 = sld [smem:[#allocation30_spill]]  ;;  %s2000_s29 = int_to_ptr.vmem [resolvable:$true] %s360_s29 }
  0x15   : > { %s2454_s24 = scalar_select %p1985_p3, 1, 0 }
  0x16   : > { %p1368_p5 = pneg %p1985_p3 }
  0x17   : > { %2455 = sst [smem:[#allocation28_spill]] %s2454_s24 }
  0x18   : > { %p1994_p6 = pnand %p1368_p5, %p2447_p1 }
  0x1a   : > { %s1480_s13 = scalar_lea.hbm %s2457_s1, 128  ;;  %p2010_p8 = pneg %p1994_p6 }
  0x1b   : > { %p1481_p7 = scmp.ne.s32.totalorder %s2457_s1, %s1480_s13  ;;  %p1487_p11 = scmp.lt.u32.totalorder %s1480_s13, %s2457_s1 }
  0x1d   : > { %p1483_p9 = pnand %p2010_p8, %p1481_p7 }
  0x1f   : > { %p1484_p10 = pneg %p1483_p9 }
  0x21   : > { %p1489_p12 = pnand %p1487_p11, %p1484_p10 }
  0x23   : > { %1492 = shalt.err (!%p1489_p12)
}
  0x24   : > { %s1493_s28 = scalar_lea.vmem %s1983_s22, 128  ;;  %p1501_p5 = scmp.lt.s32.totalorder %s1983_s22, %s1983_s22 }
  0x25   : > { %p1494_p13 = scmp.ne.s32.totalorder %s1983_s22, %s1493_s28  ;;  %p1502_p4 = scmp.lt.s32.totalorder %s1493_s28, %s1493_s28 }
  0x27   : > { %p1496_p0 = pnand %p1494_p13, %p2010_p8  ;;  %p1503_p7 = por %p1502_p4, %p1501_p5 }
  0x29   : > { %p1497_p2 = pneg %p1496_p0 }
  0x2b   : > { %p1504_p9 = pnand %p1503_p7, %p1497_p2 }
  0x2d   : > { %1507 = shalt.err (!%p1504_p9)
}
  0x2e   : > { %s2445_s30 = smov 64   ;;  %s1882_s12 = smov 4  }
  0x2f   : > { %1371 = dma.hbm_to_vmem [thread:$0]  (!%p1994_p6), %s2457_s1, 128, %s1983_s22, [#allocation6], %s2445_s30, %s2445_s30, %s1882_s12  }
  0x30   : > { %s1508_s25 = scalar_lea.hbm %s2433_s3, 128 }
  0x31   : > { %p1509_p4 = scmp.ne.s32.totalorder %s2433_s3, %s1508_s25  ;;  %p1515_p12 = scmp.lt.u32.totalorder %s1508_s25, %s2433_s3 }
  0x33   : > { %p1511_p10 = pnand %p1509_p4, %p2010_p8 }
  0x35   : > { %p1512_p11 = pneg %p1511_p10 }
  0x37   : > { %p1517_p13 = pnand %p1515_p12, %p1512_p11 }
  0x39   : > { %1520 = shalt.err (!%p1517_p13)
}
  0x3a   : > { %s1521_s22 = scalar_lea.vmem %s1998_s26, 128  ;;  %p1529_p7 = scmp.lt.s32.totalorder %s1998_s26, %s1998_s26 }
  0x3b   : > { %p1522_p0 = scmp.ne.s32.totalorder %s1998_s26, %s1521_s22  ;;  %p1530_p9 = scmp.lt.s32.totalorder %s1521_s22, %s1521_s22 }
  0x3d   : > { %p1524_p2 = pnand %p1522_p0, %p2010_p8  ;;  %p1531_p4 = por %p1530_p9, %p1529_p7 }
  0x3f   : > { %p1525_p5 = pneg %p1524_p2 }
  0x41   : > { %p1532_p10 = pnand %p1531_p4, %p1525_p5 }
  0x43   : > { %1535 = shalt.err (!%p1532_p10)
}
  0x44   : > { %1377 = dma.hbm_to_vmem [thread:$0]  (!%p1994_p6), %s2433_s3, 128, %s1998_s26, [#allocation9], %s2445_s30, %s2445_s30, %s1882_s12  }
  0x45   : > { %s1536_s14 = scalar_lea.hbm %s2435_s5, 64 }
  0x46   : > { %p1537_p11 = scmp.ne.s32.totalorder %s2435_s5, %s1536_s14  ;;  %p1543_p0 = scmp.lt.u32.totalorder %s1536_s14, %s2435_s5 }
  0x48   : > { %p1539_p12 = pnand %p1537_p11, %p2010_p8 }
  0x4a   : > { %p1540_p13 = pneg %p1539_p12 }
  0x4c   : > { %p1545_p2 = pnand %p1543_p0, %p1540_p13 }
  0x4e   : > { %1548 = shalt.err (!%p1545_p2)
}
  0x4f   : > { %s1549_s26 = scalar_lea.vmem %s2000_s29, 64  ;;  %p1557_p4 = scmp.lt.s32.totalorder %s2000_s29, %s2000_s29 }
  0x50   : > { %p1550_p5 = scmp.ne.s32.totalorder %s2000_s29, %s1549_s26  ;;  %p1558_p10 = scmp.lt.s32.totalorder %s1549_s26, %s1549_s26 }
  0x52   : > { %p1552_p7 = pnand %p1550_p5, %p2010_p8  ;;  %p1559_p11 = por %p1558_p10, %p1557_p4 }
  0x54   : > { %p1553_p9 = pneg %p1552_p7 }
  0x56   : > { %p1560_p12 = pnand %p1559_p11, %p1553_p9 }
  0x58   : > { %1563 = shalt.err (!%p1560_p12)
}
  0x59   : > { %1383 = dma.hbm_to_vmem [thread:$0]  (!%p1994_p6), %s2435_s5, 64, %s2000_s29, [#allocation12]  }
  0x5a   : > { %s1883_s11 = smov [#allocation14]   ;;  %s1884_s13 = smov [#allocation17]  }
  0x5b   : > { %s381_s24 = sshll.u32 %s1883_s11, 4  ;;  %s405_s14 = sshll.u32 %s1884_s13, 4  ;;  %s382_s24 = int_to_ptr.vmem [resolvable:$true] %s381_s24  ;;  %s406_s14 = int_to_ptr.vmem [resolvable:$true] %s405_s14 }
  0x5c   : > { %s1564_s25 = scalar_lea.hbm %s2437_s7, 128 }
  0x5d   : > { %p1565_p13 = scmp.ne.s32.totalorder %s2437_s7, %s1564_s25  ;;  %p1571_p5 = scmp.lt.u32.totalorder %s1564_s25, %s2437_s7 }
  0x5f   : > { %p1567_p0 = pnand %p1565_p13, %p2010_p8 }
  0x61   : > { %p1568_p2 = pneg %p1567_p0 }
  0x63   : > { %p1573_p7 = pnand %p1571_p5, %p1568_p2 }
  0x65   : > { %1576 = shalt.err (!%p1573_p7)
}
  0x66   : > { %s1577_s29 = scalar_lea.vmem %s382_s24, 128  ;;  %p1585_p11 = scmp.lt.s32.totalorder %s382_s24, %s382_s24 }
  0x67   : > { %p1578_p9 = scmp.ne.s32.totalorder %s382_s24, %s1577_s29  ;;  %p1586_p12 = scmp.lt.s32.totalorder %s1577_s29, %s1577_s29 }
  0x69   : > { %p1580_p4 = pnand %p1578_p9, %p2010_p8  ;;  %p1587_p1 = por %p1586_p12, %p1585_p11 }
  0x6b   : > { %p1581_p10 = pneg %p1580_p4 }
  0x6d   : > { %p1588_p3 = pnand %p1587_p1, %p1581_p10 }
  0x6f   : > { %1591 = shalt.err (!%p1588_p3)
}
  0x70   : > { %s2459_s0 = smov 64   ;;  %s1592_s21 = scalar_lea.hbm %s2439_s9, 128 }
  0x71   : > { %1389 = dma.hbm_to_vmem [thread:$0]  (!%p1994_p6), %s2437_s7, 128, %s382_s24, [#allocation15], %s2459_s0, %s2459_s0, %s1882_s12  }
  0x72   : > { %p1593_p1 = scmp.ne.s32.totalorder %s2439_s9, %s1592_s21  ;;  %p1599_p0 = scmp.lt.u32.totalorder %s1592_s21, %s2439_s9 }
  0x74   : > { %p1595_p3 = pnand %p1593_p1, %p2010_p8 }
  0x76   : > { %p1596_p13 = pneg %p1595_p3 }
  0x78   : > { %p1601_p2 = pnand %p1599_p0, %p1596_p13 }
  0x7a   : > { %1604 = shalt.err (!%p1601_p2)
}
  0x7b   : > { %s1605_s29 = scalar_lea.vmem %s406_s14, 128  ;;  %p1613_p4 = scmp.lt.s32.totalorder %s406_s14, %s406_s14 }
  0x7c   : > { %p1606_p5 = scmp.ne.s32.totalorder %s406_s14, %s1605_s29  ;;  %p1614_p10 = scmp.lt.s32.totalorder %s1605_s29, %s1605_s29 }
  0x7e   : > { %p1608_p7 = pnand %p1606_p5, %p2010_p8  ;;  %p1615_p11 = por %p1614_p10, %p1613_p4 }
  0x80   : > { %p1609_p9 = pneg %p1608_p7 }
  0x82   : > { %p1616_p12 = pnand %p1615_p11, %p1609_p9 }
  0x84   : > { %1619 = shalt.err (!%p1616_p12)
}
  0x85   : > { %1395 = dma.hbm_to_vmem [thread:$0]  (!%p1994_p6), %s2439_s9, 128, %s406_s14, [#allocation18], %s2459_s0, %s2459_s0, %s1882_s12  }
  0x86   : > { %s1885_s11 = smov [#allocation7]   ;;  %s1886_s15 = smov [#allocation10]  }
  0x87   : > { %s325_s13 = sshll.u32 %s1885_s11, 4  ;;  %s349_s21 = sshll.u32 %s1886_s15, 4  ;;  %s326_s13 = int_to_ptr.vmem [resolvable:$true] %s325_s13  ;;  %s350_s21 = int_to_ptr.vmem [resolvable:$true] %s349_s21 }
  0x88   : > { %s2460_s2 = sld [smem:[#allocation31_spill]] }
  0x8e   : > { %s1620_s26 = scalar_lea.hbm %s2460_s2, 128 }
  0x8f   : > { %p1621_p1 = scmp.ne.s32.totalorder %s2460_s2, %s1620_s26  ;;  %p1627_p0 = scmp.lt.u32.totalorder %s1620_s26, %s2460_s2 }
  0x91   : > { %p1623_p3 = pnand %p1621_p1, %p2010_p8 }
  0x93   : > { %p1624_p13 = pneg %p1623_p3 }
  0x95   : > { %p1629_p2 = pnand %p1627_p0, %p1624_p13 }
  0x97   : > { %1632 = shalt.err (!%p1629_p2)
}
  0x98   : > { %s1633_s12 = scalar_lea.vmem %s326_s13, 128  ;;  %p1641_p4 = scmp.lt.s32.totalorder %s326_s13, %s326_s13 }
  0x99   : > { %p1634_p5 = scmp.ne.s32.totalorder %s326_s13, %s1633_s12  ;;  %p1642_p10 = scmp.lt.s32.totalorder %s1633_s12, %s1633_s12 }
  0x9b   : > { %p1636_p7 = pnand %p1634_p5, %p2010_p8  ;;  %p1643_p11 = por %p1642_p10, %p1641_p4 }
  0x9d   : > { %p1637_p9 = pneg %p1636_p7 }
  0x9f   : > { %p1644_p12 = pnand %p1643_p11, %p1637_p9 }
  0xa1   : > { %1647 = shalt.err (!%p1644_p12)
}
  0xa2   : > { %1374 = dma.hbm_to_vmem [thread:$0]  (!%p1994_p6), %s2460_s2, 128, %s326_s13, [#allocation6]  }
  0xa3   : > { %s1648_s11 = scalar_lea.hbm %s2434_s4, 128 }
  0xa4   : > { %p1649_p1 = scmp.ne.s32.totalorder %s2434_s4, %s1648_s11  ;;  %p1655_p0 = scmp.lt.u32.totalorder %s1648_s11, %s2434_s4 }
  0xa6   : > { %p1651_p3 = pnand %p1649_p1, %p2010_p8 }
  0xa8   : > { %p1652_p13 = pneg %p1651_p3 }
  0xaa   : > { %p1657_p2 = pnand %p1655_p0, %p1652_p13 }
  0xac   : > { %1660 = shalt.err (!%p1657_p2)
}
  0xad   : > { %s1661_s22 = scalar_lea.vmem %s350_s21, 128  ;;  %p1669_p4 = scmp.lt.s32.totalorder %s350_s21, %s350_s21 }
  0xae   : > { %p1662_p5 = scmp.ne.s32.totalorder %s350_s21, %s1661_s22  ;;  %p1670_p10 = scmp.lt.s32.totalorder %s1661_s22, %s1661_s22 }
  0xb0   : > { %p1664_p7 = pnand %p1662_p5, %p2010_p8  ;;  %p1671_p11 = por %p1670_p10, %p1669_p4 }
  0xb2   : > { %p1665_p9 = pneg %p1664_p7 }
  0xb4   : > { %p1672_p12 = pnand %p1671_p11, %p1665_p9 }
  0xb6   : > { %1675 = shalt.err (!%p1672_p12)
}
  0xb7   : > { %1380 = dma.hbm_to_vmem [thread:$0]  (!%p1994_p6), %s2434_s4, 128, %s350_s21, [#allocation9]  }
  0xb8   : > { %s1887_s24 = smov [#allocation13]   ;;  %s1888_s14 = smov [#allocation16]  }
  0xb9   : > { %s371_s12 = sshll.u32 %s1887_s24, 4  ;;  %s395_s0 = sshll.u32 %s1888_s14, 4  ;;  %s372_s12 = int_to_ptr.vmem [resolvable:$true] %s371_s12  ;;  %s396_s0 = int_to_ptr.vmem [resolvable:$true] %s395_s0 }
  0xba   : > { %s1676_s11 = scalar_lea.hbm %s2436_s6, 128 }
  0xbb   : > { %p1677_p1 = scmp.ne.s32.totalorder %s2436_s6, %s1676_s11  ;;  %p1683_p0 = scmp.lt.u32.totalorder %s1676_s11, %s2436_s6 }
  0xbd   : > { %p1679_p3 = pnand %p1677_p1, %p2010_p8 }
  0xbf   : > { %p1680_p13 = pneg %p1679_p3 }
  0xc1   : > { %p1685_p2 = pnand %p1683_p0, %p1680_p13 }
  0xc3   : > { %1688 = shalt.err (!%p1685_p2)
}
  0xc4   : > { %s1689_s21 = scalar_lea.vmem %s372_s12, 128  ;;  %p1697_p4 = scmp.lt.s32.totalorder %s372_s12, %s372_s12 }
  0xc5   : > { %p1690_p5 = scmp.ne.s32.totalorder %s372_s12, %s1689_s21  ;;  %p1698_p10 = scmp.lt.s32.totalorder %s1689_s21, %s1689_s21 }
  0xc7   : > { %p1692_p7 = pnand %p1690_p5, %p2010_p8  ;;  %p1699_p11 = por %p1698_p10, %p1697_p4 }
  0xc9   : > { %p1693_p9 = pneg %p1692_p7 }
  0xcb   : > { %p1700_p12 = pnand %p1699_p11, %p1693_p9 }
  0xcd   : > { %1703 = shalt.err (!%p1700_p12)
}
  0xce   : > { %1386 = dma.hbm_to_vmem [thread:$0]  (!%p1994_p6), %s2436_s6, 128, %s372_s12, [#allocation12]  }
  0xcf   : > { %s1704_s14 = scalar_lea.hbm %s2438_s8, 128 }
  0xd0   : > { %p1705_p1 = scmp.ne.s32.totalorder %s2438_s8, %s1704_s14  ;;  %p1711_p0 = scmp.lt.u32.totalorder %s1704_s14, %s2438_s8 }
  0xd2   : > { %p1707_p3 = pnand %p1705_p1, %p2010_p8 }
  0xd4   : > { %p1708_p13 = pneg %p1707_p3 }
  0xd6   : > { %p1713_p2 = pnand %p1711_p0, %p1708_p13 }
  0xd8   : > { %1716 = shalt.err (!%p1713_p2)
}
  0xd9   : > { %s1717_s25 = scalar_lea.vmem %s396_s0, 128  ;;  %p1725_p4 = scmp.lt.s32.totalorder %s396_s0, %s396_s0 }
  0xda   : > { %p1718_p5 = scmp.ne.s32.totalorder %s396_s0, %s1717_s25  ;;  %p1726_p10 = scmp.lt.s32.totalorder %s1717_s25, %s1717_s25 }
  0xdc   : > { %p1720_p7 = pnand %p1718_p5, %p2010_p8  ;;  %p1727_p11 = por %p1726_p10, %p1725_p4 }
  0xde   : > { %p1721_p9 = pneg %p1720_p7 }
  0xe0   : > { %p1728_p12 = pnand %p1727_p11, %p1721_p9 }
  0xe2   : > { %1731 = shalt.err (!%p1728_p12)
}
  0xe3   : > { %1392 = dma.hbm_to_vmem [thread:$0]  (!%p1994_p6), %s2438_s8, 128, %s396_s0, [#allocation15]  }
  0xe4   : > { %s1889_s26 = smov [#allocation19]   ;;  %s1732_s29 = scalar_lea.hbm %s2440_s10, 128 }
  0xe5   : > { %s419_s21 = sshll.u32 %s1889_s26, 4  ;;  %p1733_p1 = scmp.ne.s32.totalorder %s2440_s10, %s1732_s29  ;;  %s420_s21 = int_to_ptr.vmem [resolvable:$true] %s419_s21 }
  0xe6   : > { %p1739_p0 = scmp.lt.u32.totalorder %s1732_s29, %s2440_s10 }
  0xe7   : > { %p1735_p3 = pnand %p1733_p1, %p2010_p8 }
  0xe9   : > { %p1736_p13 = pneg %p1735_p3 }
  0xeb   : > { %p1741_p2 = pnand %p1739_p0, %p1736_p13 }
  0xed   : > { %1744 = shalt.err (!%p1741_p2)
}
  0xee   : > { %s1745_s0 = scalar_lea.vmem %s420_s21, 128  ;;  %p1753_p4 = scmp.lt.s32.totalorder %s420_s21, %s420_s21 }
  0xef   : > { %p1746_p5 = scmp.ne.s32.totalorder %s420_s21, %s1745_s0  ;;  %p1754_p10 = scmp.lt.s32.totalorder %s1745_s0, %s1745_s0 }
  0xf1   : > { %p1748_p7 = pnand %p1746_p5, %p2010_p8  ;;  %p1755_p11 = por %p1754_p10, %p1753_p4 }
  0xf3   : > { %p1749_p9 = pneg %p1748_p7 }
  0xf5   : > { %p1756_p12 = pnand %p1755_p11, %p1749_p9 }
  0xf7   : > { %1759 = shalt.err (!%p1756_p12)
}
  0xf8   : > { %1398 = dma.hbm_to_vmem [thread:$0]  (!%p1994_p6), %s2440_s10, 128, %s420_s21, [#allocation18]  }
  0xf9   : > { %s1211_s16 = sadd.s32 4294967294, %s1876_s20   ;;  %s2217_s27 = sadd.s32 1, %s1876_s20  }
  0xfa   : > { %s36_s25 = ssub.s32 %s1876_s20, %s2217_s27  ;;  %s39_s12 = sadd.s32 1, %s1872_s19 }
  0xfb   : > { %p37_p8 = scmp.eq.s32.totalorder %s36_s25, 0  ;;  %p46_p1 = scmp.ne.s32.totalorder %s1872_s19, %s1868_s18 }
  0xfc   : > { %p47_p3 = scmp.eq.s32.totalorder %s1876_s20, 0  ;;  %p52_p13 = scmp.ne.s32.totalorder %s1868_s18, %s1864_s17 }
  0xfd   : > { %s2228_s28 = scalar_select %p37_p8, %s1872_s19, %s39_s12  }
  0xfe   : > { %p2230_p0 = por %p47_p3, %p46_p1  ;;  %p2462_p2 = scmp.eq.s32.totalorder %s1978_s23, 0 }
  0xff   : > { %p286_p5 = scmp.eq.s32.totalorder %s1978_s23, 1  ;;  %p292_p7 = scmp.eq.s32.totalorder %s1211_s16, 1 }
 0x100   : > { %p2236_p6 = por %p2462_p2, %p52_p13  ;;  %p1417_p9 = scmp.lt.s32.totalorder %s1876_s20, 2 }
 0x101   : > { %s430_s22 = sand.u32 1, %s1872_s19   ;;  %p2243_p4 = por %p286_p5, %p46_p1 }
 0x102   : > { %p2247_p10 = por %p292_p7, %p52_p13  ;;  %s1224_s24 = sshll.u32 %s430_s22, 2 }
 0x103   : > { %s2464_s13 = scalar_select %p2243_p4, 1, 0 }
 0x104   : > { %s2465_s29 = scalar_select %p2247_p10, 1, 0 }
 0x105   : > { %s1225_s14 = sshll.u32 %s1876_s20, 6  ;;  %s2466_s0 = sld [smem:[#allocation29_spill]] }
 0x106   : > { %s434_s15 = scalar_lea.vmem [#allocation2], %s1224_s24  ;;  %p2261_p11 = pnand %p1417_p9, %p2230_p0 }
 0x107   : > { %s441_s16 = sshll.u32 %s434_s15, 4  ;;  %s431_s12 = scalar_lea.sflag [#allocation3], %s430_s22  ;;  %s2257_s16 = int_to_ptr.vmem [resolvable:$true] %s441_s16 }
 0x108   : > { %p1762_p8 = pneg %p2261_p11 }
 0x10b   : > { %s2255_s11 = scalar_lea.hbm %s2466_s0, %s1225_s14  ;;  %s1765_s1 = scalar_lea.hbm %s2466_s0, 128 }
 0x10c   : > { %s1760_s2 = scalar_lea.hbm %s2255_s11, 64  ;;  %p1766_p13 = scmp.lt.u32.totalorder %s2255_s11, %s2466_s0 }
 0x10d   : > { %p1761_p12 = scmp.ne.s32.totalorder %s2255_s11, %s1760_s2  ;;  %p1767_p0 = scmp.lt.u32.totalorder %s1765_s1, %s1760_s2 }
 0x10e   : > { %p1769_p5 = scmp.lt.u32.totalorder %s1760_s2, %s2255_s11 }
 0x10f   : > { %p1763_p1 = pnand %p1762_p8, %p1761_p12  ;;  %p1768_p2 = por %p1767_p0, %p1766_p13 }
 0x111   : > { %p1764_p3 = pneg %p1763_p1  ;;  %p1770_p7 = por %p1769_p5, %p1768_p2 }
 0x113   : > { %p1771_p9 = pnand %p1770_p7, %p1764_p3 }
 0x115   : > { %1774 = shalt.err (!%p1771_p9)
}
 0x116   : > { %s1775_s22 = scalar_lea.vmem %s2257_s16, 64  ;;  %s1890_s15 = smov [#allocation2]  }
 0x117   : > { %p1776_p12 = scmp.ne.s32.totalorder %s2257_s16, %s1775_s22  ;;  %s1780_s24 = sshll.u32 %s1890_s15, 4  ;;  %s1781_s24 = int_to_ptr.vmem [resolvable:$false] %s1780_s24 }
 0x118   : > { %s1782_s14 = scalar_lea.vmem %s1781_s24, 128  ;;  %p1783_p4 = scmp.lt.s32.totalorder %s2257_s16, %s1781_s24 }
 0x119   : > { %p1778_p1 = pnand %p1776_p12, %p1762_p8  ;;  %p1784_p13 = scmp.lt.s32.totalorder %s1782_s14, %s1775_s22 }
 0x11b   : > { %p1779_p10 = pneg %p1778_p1  ;;  %p1785_p0 = por %p1784_p13, %p1783_p4 }
 0x11d   : > { %p1786_p2 = pnand %p1785_p0, %p1779_p10 }
 0x11f   : > { %1789 = shalt.err (!%p1786_p2)
}
 0x120   : > { %1402 = dma.hbm_to_vmem [thread:$0]  (!%p2261_p11), %s2255_s11, 64, %s2257_s16, %s431_s12  }
 0x121   : > { %s2468_s2 = sld [smem:[#allocation28_spill]] }
 0x127   : > { %p2469_p3 = scmp.ne.s32.totalorder %s2468_s2, 0 }
 0x128   : > { %s2293_s1 = sand.u32 (!%p2469_p3), 1, %s1868_s18  }
 0x129   : > { %450 = sbr.rel (%p2469_p3) target bundleno = 1706 (0x6aa), region = 64  ;;  %s1227_s26 = sshll.u32 (!%p2469_p3), %s2293_s1, 2 }
 0x12a   : > { %s453_s30 = scalar_lea.sflag (!%p2469_p3), [#allocation3], %s2293_s1  ;;  %s456_s22 = scalar_lea.vmem (!%p2469_p3), [#allocation2], %s1227_s26 }
 0x130   : > { %1835 = dma.done.wait (%p2236_p6), %s453_s30, 64  }
 0x131   : > { %1837 = vsyncadd (%p2236_p6), %s453_s30, 4294967232  ;;  %p2470_p4 = scmp.eq.s32.totalorder %s1978_s23, 0 }
 0x133   : > { %1839 = dma.done.wait (%p2470_p4), [#allocation6], 256   ;;  %p2471_p10 = pmov %p2470_p4 }
 0x134   : > { %p2472_p11 = pmov %p2470_p4 }
 0x135   : > { %1841 = vsyncadd (%p2471_p10), [#allocation6], 4294967040 }
 0x136   : > { %1843 = dma.done.wait (%p2472_p11), [#allocation9], 256   ;;  %p2473_p8 = pmov %p2470_p4 }
 0x137   : > { %p2474_p5 = pmov %p2470_p4 }
 0x138   : > { %1845 = vsyncadd (%p2473_p8), [#allocation9], 4294967040 }
 0x139   : > { %1847 = dma.done.wait (%p2474_p5), [#allocation12], 192   ;;  %p2475_p7 = pmov %p2470_p4 }
 0x13a   : > { %p2476_p6 = pmov %p2470_p4 }
 0x13b   : > { %1849 = vsyncadd (%p2475_p7), [#allocation12], 4294967104 }
 0x13c   : > { %1851 = dma.done.wait (%p2476_p6), [#allocation15], 256   ;;  %p2477_p9 = pmov %p2470_p4 }
 0x13d   : > { %p2478_p12 = pmov %p2470_p4 }
 0x13e   : > { %1853 = vsyncadd (%p2477_p9), [#allocation15], 4294967040 }
 0x13f   : > { %1855 = dma.done.wait (%p2478_p12), [#allocation18], 256   ;;  %p2479_p1 = pmov %p2470_p4 }
 0x140   : > { %v1891_v0 = vmov 0.0   ;;  %vm1892_vm0 = vmmov 0   ;;  %v1893_v1 = vmov 0   ;;  %v536_v2 = vld [vmem:[%s456_s22] sm:$0xf]  ;;  %vm552_vm1 = vcmask 1041408  }
 0x141   : > { %1857 = vsyncadd (%p2479_p1), [#allocation18], 4294967040  ;;  %1270 = vmatprep.subr.bf16.mxu0 %v1891_v0  ;;  %1272 = vmatprep.mubr.msk.bf16.mxu0 %vm1892_vm0, %v1891_v0  ;;  %s1894_s21 = smov 1   ;;  %v539_v3 = vpack.c.bf16 %v536_v2, %v536_v2  ;;  %v642_v4 = vld [vmem:[#allocation7] sm:$0xff]  ;;  %v547_v6 = vld [vmem:[#allocation5 + $0x4] sm:$0xf]  ;;  %v537_v7 = vlaneseq }
 0x142   : > { %1276 = vmatprep.subr.bf16.mxu1 %v1891_v0  ;;  %1278 = vmatprep.mubr.msk.bf16.mxu1 %vm1892_vm0, %v1891_v0  ;;  %vm548_vm2 = vcmask 31744   ;;  %v545_v13 = vld [vmem:[#allocation5] sm:$0xf]  ;;  %vm662_vm4 = vcmask 1043456   ;;  %v752_v27 = vld [vmem:[#allocation10] sm:$0xff]  ;;  %vm658_vm5 = vcmask 64512  }
 0x143   : > { %1478 = vset.pattern.permute.xlu0 %v1893_v1  ;;  %1479 = vset.pattern.permute.xlu1 %v1893_v1  ;;  %v554_v5 = vsel %vm552_vm1, %v539_v3, 0  ;;  %v2333_v8 = vand.u32 127, %v537_v7  ;;  %v657_v29 = vld [vmem:[#allocation8 + $0x4] sm:$0xf]  ;;  %v761_v30 = vld [vmem:[#allocation13] sm:$0xff]  ;;  %s1895_s11 = smov 2  }
 0x144   : > { %540 = vrot.lane.b32.xlu0 %v536_v2, %s1894_s21  ;;  %1271 = vmatpush3.bf16.msra.mxu0 %v554_v5  ;;  %v913_v31 = vld [vmem:[#allocation16] sm:$0xff]  ;;  %v760_v32 = vld [vmem:[#allocation11] sm:$0xf]  ;;  %v1021_v33 = vld [vmem:[#allocation19] sm:$0xff]  ;;  %s1238_s16 = sshll.u32 %s2293_s1, 3  ;;  %s1249_s25 = sshll.u32 %s1978_s23, 7 }
 0x145   : > { %1282 = vmatprep.subr.bf16.mxu0 %v1891_v0  ;;  %vm542_vm3 = vcmp.ge.s32.totalorder %v2333_v8, 1  ;;  %v655_v38 = vld [vmem:[#allocation8] sm:$0xf]  ;;  %vm815_vm6 = vcmp.ge.s32.totalorder %v2333_v8, 2  ;;  %v818_v3 = vld [vmem:[#allocation14] sm:$0xf] }
 0x146   : > { %v820_v61 = vld [vmem:[#allocation14 + $0x4] sm:$0xf]  ;;  %s534_s12 = scalar_lea.vmem [#allocation20], %s1238_s16  ;;  %s2480_s2 = sld [smem:[#allocation32_spill]] }
 0x147   : > { %1273 = vmatmul.mubr.msk.bf16.vlgmr.msra.gmra.mrb[0].mxu0 %vm548_vm2, %v547_v6  ;;  %s1046_s15 = sshll.u32 %s534_s12, 4  ;;  %s1033_s30 = scalar_lea.sflag [#allocation4], %s2293_s1  ;;  %s2388_s15 = int_to_ptr.vmem [resolvable:$true] %s1046_s15 }
 0x148   : > { %645 = vperm.xlu0 %1478, %v642_v4   ;;  %1284 = vmatprep.mubr.msk.bf16.mxu0 %vm1892_vm0, %v1891_v0  ;;  %s1790_s22 = scalar_lea.vmem %s2388_s15, 128  ;;  %p2481_p0 = scmp.ne.s32.totalorder %s2464_s13, 0 }
 0x149   : > { %p1791_p13 = scmp.ne.s32.totalorder %s2388_s15, %s1790_s22  ;;  %s1896_s23 = smov [#allocation20]  }
 0x14b   : > { %p1792_p2 = pnand %p1791_p13, %p2481_p0 }
 0x14c   : > { %s2386_s26 = scalar_lea.hbm %s2480_s2, %s1249_s25 }
 0x14d   : > { %p1793_p3 = pneg %p1792_p2 }
 0x1b6   : > { %v541_v9 = vpop.permute.xlu0 %540 }
 0x1b7   : > { %v543_v10 = vsel %vm542_vm3, %v541_v9, 0.0 }
 0x1b8   : > { %v544_v11 = vpack.c.bf16 %v543_v10, %v543_v10 }
 0x1ba   : > { %v600_v12 = vsel %vm552_vm1, %v544_v11, 0 }
 0x1bb   : > { %1277 = vmatpush3.bf16.msra.mxu1 %v600_v12 }
 0x1bc   : > { %1288 = vmatprep.subr.bf16.mxu1 %v1891_v0 }
 0x1be   : > { %1279 = vmatmul.mubr.msk.bf16.vlgmr.msra.gmra.mrb[0].mxu1 %vm548_vm2, %v545_v13 }
 0x1bf   : > { %1290 = vmatprep.mubr.msk.bf16.mxu1 %vm1892_vm0, %v1891_v0 }
 0x1c7   : > { %v646_v19 = vpop.permute.xlu0 %645 }
 0x21a   : > { %v590_v14 = vpop.f32.mrb[0].mxu0 }
 0x21b   : > { %v1274_v15 = vpop.f32.mrb[1].mxu0 }
 0x21c   : > { %v593_v16 = vpop.f32.mrb[2].mxu0 }
 0x21d   : > { %v1275_v17 = vpop.f32.mrb[3].mxu0 }
 0x291   : > { %v636_v18 = vpop.f32.mrb[0].mxu1 }
 0x292   : > { %v637_v20 = vadd.f32 %v636_v18, %v590_v14  ;;  %v1280_v21 = vpop.f32.mrb[1].mxu1 }
 0x293   : > { %v639_v22 = vpop.f32.mrb[2].mxu1 }
 0x294   : > { %v648_v23 = vadd.f32 %v646_v19, %v637_v20  ;;  %v1281_v24 = vpop.f32.mrb[3].mxu1 }
 0x296   : > { %v649_v25 = vmax.f32 %v648_v23, 0.0  ;;  %v926_v23 = vld [vmem:[#allocation17] sm:$0xf] }
 0x298   : > { %v650_v26 = vpack.c.bf16 %v649_v25, %v649_v25  ;;  %651 = vrot.lane.b32.xlu1 %v649_v25, %s1894_s21  ;;  %s1794_s21 = sshll.u32 %s1896_s23, 4  ;;  %s1795_s21 = int_to_ptr.vmem [resolvable:$false] %s1794_s21 }
 0x299   : > { %p1797_p4 = scmp.lt.s32.totalorder %s2388_s15, %s1795_s21 }
 0x29a   : > { %v664_v28 = vsel %vm662_vm4, %v650_v26, 0 }
 0x29b   : > { %1283 = vmatpush3.bf16.msra.mxu0 %v664_v28 }
 0x29c   : > { %1294 = vmatprep.subr.bf16.mxu0 %v1891_v0  ;;  %755 = vperm.xlu1 %1479, %v752_v27  }
 0x29e   : > { %1285 = vmatmul.mubr.msk.bf16.vlgmr.msra.gmra.mrb[4].mxu0 %vm658_vm5, %v657_v29 }
 0x29f   : > { %1295 = vmatpush3.bf16.msra.mxu0 %v554_v5  ;;  %1296 = vmatprep.mubr.msk.bf16.mxu0 %vm1892_vm0, %v1891_v0 }
 0x2a0   : > { %764 = vperm.xlu1 %1479, %v761_v30   ;;  %1306 = vmatprep.subr.bf16.mxu0 %v1891_v0 }
 0x2a4   : > { %916 = vperm.xlu1 %1479, %v913_v31  }
 0x2a6   : > { %1297 = vmatmul.mubr.msk.bf16.vlgmr.msra.gmra.mrb[8].mxu0 %vm548_vm2, %v760_v32 }
 0x2a7   : > { %1308 = vmatprep.mubr.msk.bf16.mxu0 %vm1892_vm0, %v1891_v0 }
 0x2a8   : > { %1024 = vperm.xlu1 %1479, %v1021_v33  }
 0x30a   : > { %v652_v34 = vpop.permute.xlu1 %651 }
 0x30b   : > { %v653_v35 = vsel %vm542_vm3, %v652_v34, 0.0 }
 0x30c   : > { %v654_v36 = vpack.c.bf16 %v653_v35, %v653_v35 }
 0x30e   : > { %v710_v37 = vsel %vm662_vm4, %v654_v36, 0 }
 0x30f   : > { %1289 = vmatpush3.bf16.msra.mxu1 %v710_v37 }
 0x310   : > { %1300 = vmatprep.subr.bf16.mxu1 %v1891_v0 }
 0x312   : > { %1291 = vmatmul.mubr.msk.bf16.vlgmr.msra.gmra.mrb[4].mxu1 %vm658_vm5, %v655_v38 }
 0x313   : > { %1302 = vmatprep.mubr.msk.bf16.mxu1 %vm1892_vm0, %v1891_v0 }
 0x31b   : > { %v756_v47 = vpop.permute.xlu1 %755 }
 0x31f   : > { %v765_v54 = vpop.permute.xlu1 %764 }
 0x323   : > { %v917_v12 = vpop.permute.xlu1 %916 }
 0x327   : > { %v1025_v31 = vpop.permute.xlu1 %1024 }
 0x371   : > { %v700_v39 = vpop.f32.mrb[4].mxu0 }
 0x372   : > { %v1286_v40 = vpop.f32.mrb[5].mxu0 }
 0x373   : > { %v703_v41 = vpop.f32.mrb[6].mxu0 }
 0x374   : > { %v1287_v42 = vpop.f32.mrb[7].mxu0 }
 0x379   : > { %v804_v43 = vpop.f32.mrb[8].mxu0 }
 0x37a   : > { %v1298_v44 = vpop.f32.mrb[9].mxu0  ;;  %v805_v56 = vadd.f32 %v804_v43, %v765_v54 }
 0x37b   : > { %v807_v45 = vpop.f32.mrb[10].mxu0 }
 0x37c   : > { %v1299_v46 = vpop.f32.mrb[11].mxu0 }
 0x3e5   : > { %v746_v48 = vpop.f32.mrb[4].mxu1 }
 0x3e6   : > { %v747_v49 = vadd.f32 %v746_v48, %v700_v39  ;;  %v1292_v50 = vpop.f32.mrb[5].mxu1 }
 0x3e7   : > { %v749_v51 = vpop.f32.mrb[6].mxu1 }
 0x3e8   : > { %v758_v52 = vadd.f32 %v756_v47, %v747_v49  ;;  %v1293_v53 = vpop.f32.mrb[7].mxu1 }
 0x3ea   : > { %v759_v55 = vmax.f32 %v758_v52, 0.0 }
 0x3ec   : > { %v810_v57 = vadd.f32 %v805_v56, %v759_v55 }
 0x3ee   : > { %v811_v58 = vmax.f32 %v810_v57, 0.0 }
 0x3f0   : > { %813 = vrot.lane.b32.xlu0 %v811_v58, %s1895_s11  ;;  %v812_v59 = vpack.c.bf16 %v811_v58, %v811_v58 }
 0x3f2   : > { %v825_v60 = vsel %vm662_vm4, %v812_v59, 0 }
 0x3f3   : > { %1301 = vmatpush3.bf16.msra.mxu1 %v825_v60 }
 0x3f4   : > { %1312 = vmatprep.subr.bf16.mxu1 %v1891_v0 }
 0x3f6   : > { %1303 = vmatmul.mubr.msk.bf16.vlgmr.msra.gmra.mrb[8].mxu1 %vm658_vm5, %v820_v61 }
 0x3f7   : > { %1314 = vmatprep.mubr.msk.bf16.mxu1 %vm1892_vm0, %v1891_v0 }
 0x462   : > { %v814_v62 = vpop.permute.xlu0 %813 }
 0x463   : > { %v816_v63 = vsel %vm815_vm6, %v814_v62, 0.0 }
 0x464   : > { %v817_v1 = vpack.c.bf16 %v816_v63, %v816_v63 }
 0x466   : > { %v871_v2 = vsel %vm662_vm4, %v817_v1, 0 }
 0x467   : > { %1307 = vmatpush3.bf16.msra.mxu0 %v871_v2 }
 0x468   : > { %1318 = vmatprep.subr.bf16.mxu0 %v1891_v0 }
 0x46a   : > { %1309 = vmatmul.mubr.msk.bf16.vlgmr.msra.gmra.mrb[12].mxu0 %vm658_vm5, %v818_v3 }
 0x46b   : > { %1320 = vmatprep.mubr.msk.bf16.mxu0 %vm1892_vm0, %v1891_v0  ;;  %v928_v0 = vld [vmem:[#allocation17 + $0x4] sm:$0xf] }
 0x4c9   : > { %v861_v4 = vpop.f32.mrb[8].mxu1 }
 0x4ca   : > { %v1304_v5 = vpop.f32.mrb[9].mxu1 }
 0x4cb   : > { %v864_v6 = vpop.f32.mrb[10].mxu1 }
 0x4cc   : > { %v1305_v7 = vpop.f32.mrb[11].mxu1 }
 0x53d   : > { %v907_v9 = vpop.f32.mrb[12].mxu0 }
 0x53e   : > { %v908_v10 = vadd.f32 %v907_v9, %v861_v4  ;;  %v1310_v11 = vpop.f32.mrb[13].mxu0 }
 0x53f   : > { %v910_v13 = vpop.f32.mrb[14].mxu0 }
 0x540   : > { %v919_v14 = vadd.f32 %v917_v12, %v908_v10  ;;  %v1311_v15 = vpop.f32.mrb[15].mxu0 }
 0x542   : > { %v920_v16 = vmax.f32 %v919_v14, 0.0 }
 0x544   : > { %v921_v17 = vpack.c.bf16 %v920_v16, %v920_v16  ;;  %922 = vrot.lane.b32.xlu0 %v920_v16, %s1895_s11  ;;  %s1796_s11 = scalar_lea.vmem %s1795_s21, 256 }
 0x545   : > { %p1798_p10 = scmp.lt.s32.totalorder %s1796_s11, %s1790_s22 }
 0x546   : > { %v933_v18 = vsel %vm662_vm4, %v921_v17, 0 }
 0x547   : > { %1313 = vmatpush3.bf16.msra.mxu1 %v933_v18  ;;  %p1799_p11 = por %p1798_p10, %p1797_p4 }
 0x549   : > { %p1800_p8 = pnand %p1799_p11, %p1793_p3 }
 0x54a   : > { %1315 = vmatmul.mubr.msk.bf16.vlgmr.msra.gmra.mrb[12].mxu1 %vm658_vm5, %v928_v0 }
 0x5b6   : > { %v923_v19 = vpop.permute.xlu0 %922 }
 0x5b7   : > { %v924_v20 = vsel %vm815_vm6, %v923_v19, 0.0 }
 0x5b8   : > { %v925_v21 = vpack.c.bf16 %v924_v20, %v924_v20 }
 0x5ba   : > { %v979_v22 = vsel %vm662_vm4, %v925_v21, 0 }
 0x5bb   : > { %1319 = vmatpush3.bf16.msra.mxu0 %v979_v22 }
 0x5be   : > { %1321 = vmatmul.mubr.msk.bf16.vlgmr.msra.gmra.mrb[16].mxu0 %vm658_vm5, %v926_v23 }
 0x61d   : > { %v969_v24 = vpop.f32.mrb[12].mxu1 }
 0x61e   : > { %v1316_v25 = vpop.f32.mrb[13].mxu1 }
 0x61f   : > { %v972_v26 = vpop.f32.mrb[14].mxu1 }
 0x620   : > { %v1317_v27 = vpop.f32.mrb[15].mxu1 }
 0x691   : > { %v1015_v28 = vpop.f32.mrb[16].mxu0 }
 0x692   : > { %v1016_v29 = vadd.f32 %v1015_v28, %v969_v24  ;;  %v1322_v30 = vpop.f32.mrb[17].mxu0 }
 0x693   : > { %v1018_v8 = vpop.f32.mrb[18].mxu0 }
 0x694   : > { %v1027_v32 = vadd.f32 %v1025_v31, %v1016_v29  ;;  %v1323_v33 = vpop.f32.mrb[19].mxu0 }
 0x696   : > { %v1028_v34 = vmax.f32 %v1027_v32, 0.0 }
 0x698   : > { %v1029_v35 = vadd.f32 %v1028_v34, %v811_v58 }
 0x69a   : > { %v1030_v36 = vmax.f32 %v1029_v35, 0.0 }
 0x69c   : > { %1031 = vst [vmem:[%s534_s12] sm:$0xff] %v1030_v36 }
 0x69d   : > { %1803 = shalt.err (!%p1800_p8)
}
 0x69e   : > { %s1804_s1 = scalar_lea.hbm %s2386_s26, 128  ;;  %s1808_s12 = scalar_lea.hbm %s2480_s2, 256 }
 0x69f   : > { %p1805_p5 = scmp.ne.s32.totalorder %s2386_s26, %s1804_s1  ;;  %p1809_p9 = scmp.lt.u32.totalorder %s2386_s26, %s2480_s2 }
 0x6a0   : > { %p1810_p12 = scmp.lt.u32.totalorder %s1808_s12, %s1804_s1  ;;  %p1812_p13 = scmp.lt.u32.totalorder %s1804_s1, %s2386_s26 }
 0x6a1   : > { %p1806_p7 = pnand %p1805_p5, %p2481_p0 }
 0x6a2   : > { %p1811_p1 = por %p1810_p12, %p1809_p9 }
 0x6a3   : > { %p1807_p6 = pneg %p1806_p7 }
 0x6a4   : > { %p1813_p2 = por %p1812_p13, %p1811_p1 }
 0x6a6   : > { %p1814_p3 = pnand %p1813_p2, %p1807_p6 }
 0x6a8   : > { %1817 = shalt.err (!%p1814_p3)
}
 0x6a9   : > { %1366 = dma.vmem_to_hbm [thread:$0]  (%p2481_p0), %s2388_s15, 128, %s2386_s26, %s1033_s30  }
 0x6aa PF: > { %s1058_s22 = sand.u32 1, %s1864_s17   ;;  %p2482_p4 = scmp.ne.s32.totalorder %s2465_s29, 0 }
 0x6ab   : > { %p2483_p10 = scmp.ge.s32.totalorder %s1876_s20, 2  ;;  %s1059_s23 = scalar_lea.sflag [#allocation4], %s1058_s22 }
 0x6ad   : > { %p1404_p11 = pnand %p2483_p10, %p2482_p4 }
 0x6af   : > { %1859 = dma.done.wait (!%p1404_p11), %s1059_s23, 128  }
 0x6b0   : > { %1861 = vsyncadd (!%p1404_p11), %s1059_s23, 4294967168  ;;  %p29_p8 = scmp.ge.s32.totalorder %s2217_s27, 4   ;;  %s2484_s17 = smov %s1868_s18 }
 0x6b1   : > { %s2485_s18 = smov %s1872_s19  ;;  %s2486_s19 = smov %s2228_s28 }
 0x6b2   : > { %s2487_s20 = smov %s2217_s27  ;;  %31 = sbr.rel (!%p29_p8) target bundleno = 15 (0xf), region = 153 }
 0x6b9   :  { %1064 = vsyncpa [#allocation3], 1 }
 0x6ba   :  { %1066 = vsyncpa [#allocation3 + $0x1], 1 }
 0x6bb   :  { %1067 = vsyncpa [#allocation6], 1 }
 0x6bc   :  { %1068 = vsyncpa [#allocation9], 1 }
 0x6bd   :  { %1069 = vsyncpa [#allocation12], 1 }
 0x6be   :  { %1070 = vsyncpa [#allocation15], 1 }
 0x6bf   :  { %1071 = vsyncpa [#allocation18], 1 }
 0x6c0   :  { %1072 = vsyncpa [#allocation4], 1 }
 0x6c1   :  { %1074 = vsyncpa [#allocation4 + $0x1], 1 }

</bundles_post_ra>
